<compile_context>
chip_gen: v7x
topology: tpu7x:2x2x1
jax: 0.10.0
libtpu: 0.0.40
codegen_flags: <defaults>
</compile_context>

<pallas_src>
import jax
import jax.numpy as jnp
from jax import lax
from jax.experimental import pallas as pl
from jax.experimental.pallas import tpu as pltpu


def _round_up(a: int, m: int) -> int:
    return (a + m - 1) // m * m


def _cdiv(a: int, m: int) -> int:
    return (a + m - 1) // m


def _device_kind() -> str:
    try:
        return jax.devices()[0].device_kind.lower()
    except Exception:
        return ""


def _vmem_capacity_bytes() -> int:
    try:
        return int(pltpu.get_tpu_info().vmem_capacity_bytes)
    except Exception:
        pass
    return (64 << 20) if "v7" in _device_kind() else (128 << 20)


def _mxu_m_width() -> int:
    kind = _device_kind()
    return 256 if ("v6" in kind or "v7" in kind) else 128   # v5e/older: 128x128 MXU


def _pad_cast(a, shape, dtype):
    """Zero-pad `a` up to `shape` and cast to `dtype`; no-op when already matching."""
    dtype = jnp.dtype(dtype)
    if tuple(a.shape) == tuple(shape) and a.dtype == dtype:
        return a
    a = a.astype(dtype)
    if tuple(a.shape) == tuple(shape):
        return a
    buf = jnp.zeros(shape, dtype)
    return buf.at[tuple(slice(0, s) for s in a.shape)].set(a)


def _spec(shape, index_map, *, single_buffer=False):
    """BlockSpec; grid-constant inputs drop the (wasted) second pipeline buffer."""
    if single_buffer:
        try:
            return pl.BlockSpec(shape, index_map, pipeline_mode=pl.Buffered(1))
        except (AttributeError, TypeError):   # older jax: fall back to default buffering
            pass
    return pl.BlockSpec(shape, index_map)


def tied_ae_kernel(x_ref, w_ref, b_enc_ref, b_dec_ref, out_ref, acc_ref):
    k = pl.program_id(1)

    @pl.when(k == 0)
    def _():
        acc_ref[...] = jnp.zeros_like(acc_ref)

    x = x_ref[...]          # (bm, inp_p)  compute dtype
    w = w_ref[...]          # (bo, inp_p)  out-chunk of the tied weight (PyTorch layout)

    # Encoder chunk: contract x and w on their `inp` (lane) axes -> (bm, bo) f32.
    # Same contraction form as q @ k^T in flash attention (MXU-native; no
    # per-step relayout / transpose of the weight chunk).
    h = lax.dot_general(x, w, dimension_numbers=(((1,), (1,)), ((), ())),
                        preferred_element_type=jnp.float32)
    h = jnp.maximum(h + b_enc_ref[...], 0.0)            # bias + ReLU (VPU, f32)

    # Tied decoder chunk: recon = sum_k h_k @ W_k.  Cast h back to the weight
    # dtype so a bf16 weight keeps both matmuls on the fast MXU path; accumulate f32.
    acc_ref[...] += lax.dot_general(h.astype(w.dtype), w,
                                    dimension_numbers=(((1,), (0,)), ((), ())),
                                    preferred_element_type=jnp.float32)

    @pl.when(k == pl.num_programs(1) - 1)
    def _():
        out_ref[...] = (acc_ref[...] + b_dec_ref[...]).astype(out_ref.dtype)


def tied_autoencoder(x, w_enc, b_enc, b_dec, *, bm=None, bo=None, compute_dtype=None):
    """x: (B, inp); w_enc: (out, inp) (PyTorch Linear layout); b_enc: (out,); b_dec: (inp,)."""
    B, inp = x.shape
    out, inp_w = w_enc.shape
    assert inp_w == inp

    out_dtype = x.dtype
    out_isz = jnp.dtype(out_dtype).itemsize
    cdt = jnp.dtype(compute_dtype) if compute_dtype is not None else jnp.dtype(x.dtype)

    sub = max(8, 32 // max(cdt.itemsize, 1))       # sublane multiple: 8 f32 / 16 bf16 / 32 fp8
    vmem_cap = _vmem_capacity_bytes()
    budget = vmem_cap - vmem_cap // 8              # ~87.5%: Mosaic internal-scratch headroom
    mxu_m = _mxu_m_width()

    inp_p = _round_up(inp, 128)                    # lane dim of x / w / recon
    out_p = _round_up(out, 128)                    # lane dim of h / b_enc; sublane dim of w

    # ---- batch tile: fill the MXU M dim; never shrink below the (padded) batch ----
    if bm is None:
        bm = _round_up(B, sub) if B <= mxu_m else mxu_m
    bm = max(sub, _round_up(int(bm), sub))
    B_p = _round_up(B, bm)
    grid_b = B_p // bm

    # ---- per-step VMEM estimate (drives out-chunk / batch-tile choice and the limit) ----
    def est(bm_, bo_, nk_, gb_):
        x_bufs = 1 if gb_ == 1 else 2
        w_bufs = 1 if nk_ == 1 else 2
        return (x_bufs * bm_ * inp_p * cdt.itemsize        # x tiles
                + w_bufs * bo_ * inp_p * cdt.itemsize      # weight chunk tiles
                + 2 * bm_ * inp_p * out_isz                # out tiles
                + 2 * bm_ * inp_p * 4                      # f32 accumulator + decoder-dot temp
                + bm_ * bo_ * (4 + cdt.itemsize)           # f32 h + low-precision cast copy
                + 2 * bo_ * 4 + inp_p * 4)                 # biases

    def pick_bo(bm_, gb_):
        bo_ = out_p
        while bo_ > 128 and est(bm_, bo_, _cdiv(out_p, bo_), gb_) > budget:
            bo_ = _round_up(bo_ // 2, 128)
        return bo_

    if bo is None:
        bo = pick_bo(bm, grid_b)
        # If even a 128-row out-chunk blows the budget, shrink the batch tile too.
        while est(bm, bo, _cdiv(out_p, bo), grid_b) > budget and bm > sub:
            bm = max(sub, _round_up(bm // 2, sub))
            B_p = _round_up(B, bm)
            grid_b = B_p // bm
            bo = pick_bo(bm, grid_b)
    bo = min(_round_up(int(bo), 128), out_p)

    out_pp = _round_up(out_p, bo)                  # pad `out` so the k axis divides evenly
    num_k = out_pp // bo

    # ---- pad/cast (zero padding is mathematically inert; skipped when already aligned) ----
    xp = _pad_cast(x, (B_p, inp_p), cdt)
    wp = _pad_cast(w_enc, (out_pp, inp_p), cdt)
    be = _pad_cast(b_enc.reshape(1, out), (1, out_pp), jnp.float32)
    bd = _pad_cast(b_dec.reshape(1, inp), (1, inp_p), jnp.float32)

    grid = (grid_b, num_k)
    in_specs = [
        _spec((bm, inp_p), lambda i, k: (i, 0), single_buffer=(grid_b == 1)),  # x tile
        _spec((bo, inp_p), lambda i, k: (k, 0), single_buffer=(num_k == 1)),   # tied weight chunk
        _spec((1, bo),     lambda i, k: (0, k), single_buffer=(num_k == 1)),   # encoder bias chunk
        _spec((1, inp_p),  lambda i, k: (0, 0), single_buffer=True),           # decoder bias
    ]
    out_spec = pl.BlockSpec((bm, inp_p), lambda i, k: (i, 0))  # resident across k (accumulator)

    vmem_need = est(bm, bo, num_k, grid_b) + (4 << 20)
    vmem_limit = int(min(max(vmem_need, 32 << 20), budget))

    flops = 4 * B_p * out_pp * inp_p               # two (B, out, inp) matmuls
    bytes_accessed = (xp.size * cdt.itemsize + wp.size * cdt.itemsize
                      + B_p * inp_p * out_isz + (be.size + bd.size) * 4)
    cost = pl.CostEstimate(flops=flops, transcendentals=0, bytes_accessed=bytes_accessed)

    recon = pl.pallas_call(
        tied_ae_kernel,
        out_shape=jax.ShapeDtypeStruct((B_p, inp_p), out_dtype),
        grid_spec=pltpu.PrefetchScalarGridSpec(
            num_scalar_prefetch=0,
            grid=grid,
            in_specs=in_specs,
            out_specs=out_spec,
            scratch_shapes=[pltpu.VMEM((bm, inp_p), jnp.float32)],   # f32 recon accumulator
        ),
        compiler_params=pltpu.CompilerParams(
            dimension_semantics=("parallel", "arbitrary"),
            vmem_limit_bytes=vmem_limit,
        ),
        cost_estimate=cost,
    )(xp, wp, be, bd)

    return recon[:B, :inp]


def reference(x, w_enc, b_enc, b_dec):
    h = jnp.maximum(x @ w_enc.T + b_enc, 0.0)
    return h @ w_enc + b_dec


if __name__ == "__main__":
    key = jax.random.PRNGKey(0)
    k_x, k_w, k_be, k_bd = jax.random.split(key, 4)

    B, inp, out = 16, 64, 32

    # kaiming_normal_ for the encoder weight: std = sqrt(2 / fan_in), fan_in = inp
    w_enc = jax.random.normal(k_w, (out, inp), jnp.float32) * jnp.sqrt(2.0 / inp)
    # PyTorch Linear bias default: U(-1/sqrt(fan_in), 1/sqrt(fan_in))
    b_enc = jax.random.uniform(k_be, (out,), jnp.float32,
                               minval=-1.0 / jnp.sqrt(inp), maxval=1.0 / jnp.sqrt(inp))
    b_dec = jax.random.uniform(k_bd, (inp,), jnp.float32,
                               minval=-1.0 / jnp.sqrt(out), maxval=1.0 / jnp.sqrt(out))

    x = jax.random.normal(k_x, (B, inp), jnp.float32)
    y_ref = reference(x, w_enc, b_enc, b_dec)

    # f32 path (single grid step, fully single-buffered resident weight).
    y = jax.block_until_ready(tied_autoencoder(x, w_enc, b_enc, b_dec))
    assert y.shape == (B, inp)
    assert jnp.allclose(y, y_ref, atol=1e-5, rtol=1e-5)

    # bf16 MXU path (f32 accumulation) — looser tolerance by construction.
    y_bf = jax.block_until_ready(
        tied_autoencoder(x, w_enc, b_enc, b_dec, compute_dtype=jnp.bfloat16))
    assert y_bf.shape == (B, inp)
    assert jnp.allclose(y_bf.astype(jnp.float32), y_ref, atol=1e-1, rtol=1e-1)

    # Exercise the out-chunked accumulator + multi-batch-tile path (grid = (3, 2))
    # with non-128-aligned shapes (padding path).
    B2, inp2, out2 = 24, 192, 256
    k_x2, k_w2, k_be2, k_bd2 = jax.random.split(jax.random.PRNGKey(1), 4)
    w2 = jax.random.normal(k_w2, (out2, inp2), jnp.float32) * jnp.sqrt(2.0 / inp2)
    be2 = jax.random.uniform(k_be2, (out2,), jnp.float32, minval=-0.05, maxval=0.05)
    bd2 = jax.random.uniform(k_bd2, (inp2,), jnp.float32, minval=-0.05, maxval=0.05)
    x2 = jax.random.normal(k_x2, (B2, inp2), jnp.float32)
    y2_ref = reference(x2, w2, be2, bd2)
    y2 = jax.block_until_ready(tied_autoencoder(x2, w2, be2, bd2, bm=8, bo=128))
    assert y2.shape == (B2, inp2)
    assert jnp.allclose(y2, y2_ref, atol=2e-3, rtol=2e-3)

    print("KERNEL_OK")
</pallas_src>

<mosaic_0001>
module attributes {stable_mosaic.version = 11 : i64} {
  func.func @tied_ae_kernel(%arg0: i32, %arg1: i32, %arg2: memref<16x128xf32, #tpu.memory_space<vmem>>, %arg3: memref<128x128xf32, #tpu.memory_space<vmem>>, %arg4: memref<1x128xf32, #tpu.memory_space<vmem>>, %arg5: memref<1x128xf32, #tpu.memory_space<vmem>>, %arg6: memref<16x128xf32, #tpu.memory_space<vmem>>, %arg7: memref<16x128xf32, #tpu.memory_space<vmem>>) attributes {dimension_semantics = [#tpu.dimension_semantics<parallel>, #tpu.dimension_semantics<arbitrary>], iteration_bounds = array<i64: 1, 1>, scalar_prefetch = 0 : i64, scratch_operands = 1 : i64, tpu.core_type = #tpu.core_type<tc>, window_params = [{pipeline_mode = #tpu.pipeline_mode<synchronous>, transform_indices = @transform_0, window_bounds = array<i64: 16, 128>}, {pipeline_mode = #tpu.pipeline_mode<synchronous>, transform_indices = @transform_1, window_bounds = array<i64: 128, 128>}, {pipeline_mode = #tpu.pipeline_mode<synchronous>, transform_indices = @transform_2, window_bounds = array<i64: 1, 128>}, {pipeline_mode = #tpu.pipeline_mode<synchronous>, transform_indices = @transform_3, window_bounds = array<i64: 1, 128>}, {transform_indices = @transform_4, window_bounds = array<i64: 16, 128>}]} {
    %c0_i32 = arith.constant 0 : i32
    %0 = arith.cmpi eq, %arg1, %c0_i32 : i32
    %1 = arith.extui %0 : i1 to i32
    %c0_i32_0 = arith.constant 0 : i32
    %2 = arith.cmpi ne, %1, %c0_i32_0 : i32
    scf.if %2 {
      %cst_14 = arith.constant 0.000000e+00 : f32
      %18 = vector.broadcast %cst_14 : f32 to vector<16x128xf32>
      %c0_15 = arith.constant 0 : index
      %c0_16 = arith.constant 0 : index
      %19 = vector.load %arg7[%c0_15, %c0_16] : memref<16x128xf32, #tpu.memory_space<vmem>>, vector<16x128xf32>
      tpu.vector_store %arg7[%c0_15, %c0_16], %18 {strides = array<i32>} : memref<16x128xf32, #tpu.memory_space<vmem>>, vector<16x128xf32>,
    } else {
    }
    %c0 = arith.constant 0 : index
    %c0_1 = arith.constant 0 : index
    %3 = vector.load %arg2[%c0, %c0_1] : memref<16x128xf32, #tpu.memory_space<vmem>>, vector<16x128xf32>
    %c0_2 = arith.constant 0 : index
    %c0_3 = arith.constant 0 : index
    %4 = vector.load %arg3[%c0_2, %c0_3] : memref<128x128xf32, #tpu.memory_space<vmem>>, vector<128x128xf32>
    %cst = arith.constant dense<0.000000e+00> : vector<16x128xf32>
    %5 = tpu.matmul %3, %4, %cst {dimension_numbers = #tpu.dot_dimension_numbers<[1], [1], [0], [0], [0, 0, 1, 0], [], []>} : vector<16x128xf32>, vector<128x128xf32>, vector<16x128xf32> -> vector<16x128xf32>
    %c0_4 = arith.constant 0 : index
    %c0_5 = arith.constant 0 : index
    %6 = vector.load %arg4[%c0_4, %c0_5] : memref<1x128xf32, #tpu.memory_space<vmem>>, vector<1x128xf32>
    %7 = vector.broadcast %6 : vector<1x128xf32> to vector<16x128xf32>
    %8 = arith.addf %5, %7 : vector<16x128xf32>
    %cst_6 = arith.constant 0.000000e+00 : f32
    %9 = vector.broadcast %cst_6 : f32 to vector<16x128xf32>
    %10 = arith.maximumf %8, %9 : vector<16x128xf32>
    %c0_7 = arith.constant 0 : index
    %c0_8 = arith.constant 0 : index
    %11 = vector.load %arg7[%c0_7, %c0_8] : memref<16x128xf32, #tpu.memory_space<vmem>>, vector<16x128xf32>
    %cst_9 = arith.constant dense<0.000000e+00> : vector<16x128xf32>
    %12 = tpu.matmul %10, %4, %cst_9 {dimension_numbers = #tpu.dot_dimension_numbers<[1], [0], [0], [1], [0, 0, 1, 1], [], []>} : vector<16x128xf32>, vector<128x128xf32>, vector<16x128xf32> -> vector<16x128xf32>
    %13 = arith.addf %11, %12 : vector<16x128xf32>
    %c0_10 = arith.constant 0 : index
    %c0_11 = arith.constant 0 : index
    %14 = vector.load %arg7[%c0_10, %c0_11] : memref<16x128xf32, #tpu.memory_space<vmem>>, vector<16x128xf32>
    tpu.vector_store %arg7[%c0_10, %c0_11], %13 {strides = array<i32>} : memref<16x128xf32, #tpu.memory_space<vmem>>, vector<16x128xf32>,
    %c0_i32_12 = arith.constant 0 : i32
    %15 = arith.cmpi eq, %arg1, %c0_i32_12 : i32
    %16 = arith.extui %15 : i1 to i32
    %c0_i32_13 = arith.constant 0 : i32
    %17 = arith.cmpi ne, %16, %c0_i32_13 : i32
    scf.if %17 {
      %c0_14 = arith.constant 0 : index
      %c0_15 = arith.constant 0 : index
      %18 = vector.load %arg7[%c0_14, %c0_15] : memref<16x128xf32, #tpu.memory_space<vmem>>, vector<16x128xf32>
      %c0_16 = arith.constant 0 : index
      %c0_17 = arith.constant 0 : index
      %19 = vector.load %arg5[%c0_16, %c0_17] : memref<1x128xf32, #tpu.memory_space<vmem>>, vector<1x128xf32>
      %20 = vector.broadcast %19 : vector<1x128xf32> to vector<16x128xf32>
      %21 = arith.addf %18, %20 : vector<16x128xf32>
      %c0_18 = arith.constant 0 : index
      %c0_19 = arith.constant 0 : index
      %22 = vector.load %arg6[%c0_18, %c0_19] : memref<16x128xf32, #tpu.memory_space<vmem>>, vector<16x128xf32>
      tpu.vector_store %arg6[%c0_18, %c0_19], %21 {strides = array<i32>} : memref<16x128xf32, #tpu.memory_space<vmem>>, vector<16x128xf32>,
    } else {
    }
    return
  }
  func.func @transform_0(%arg0: i32, %arg1: i32) -> (i32, i32) {
    %c0_i32 = arith.constant 0 : i32
    %c0_i32_0 = arith.constant 0 : i32
    return %arg0, %c0_i32 : i32, i32
  }
  func.func @transform_1(%arg0: i32, %arg1: i32) -> (i32, i32) {
    %c0_i32 = arith.constant 0 : i32
    %c0_i32_0 = arith.constant 0 : i32
    return %arg1, %c0_i32 : i32, i32
  }
  func.func @transform_2(%arg0: i32, %arg1: i32) -> (i32, i32) {
    %c0_i32 = arith.constant 0 : i32
    %c0_i32_0 = arith.constant 0 : i32
    return %c0_i32, %arg1 : i32, i32
  }
  func.func @transform_3(%arg0: i32, %arg1: i32) -> (i32, i32) {
    %c0_i32 = arith.constant 0 : i32
    %c0_i32_0 = arith.constant 0 : i32
    %c0_i32_1 = arith.constant 0 : i32
    return %c0_i32, %c0_i32_0 : i32, i32
  }
  func.func @transform_4(%arg0: i32, %arg1: i32) -> (i32, i32) {
    %c0_i32 = arith.constant 0 : i32
    %c0_i32_0 = arith.constant 0 : i32
    return %arg0, %c0_i32 : i32, i32
  }
}

</mosaic_0001>

<bundles_post_ra>
// kernel: tpu_custom_call.1
= control target key start
LH: loop header
LB: loop body
LE: loop exit
PB: predicated region body
PF: predicated region fallthrough
CT: control target
= control target key end

     0   :  { %9 = vsyncpa [#allocation4], 0  ;;  %s599_s0 = inlined_call_operand.hbm [shape: f32[16,128], index: 0, kind: input, shape index: {}]   ;;  %s600_s1 = inlined_call_operand.hbm [shape: f32[128,128], index: 1, kind: input, shape index: {}]   ;;  %s601_s2 = inlined_call_operand.vmem [shape: f32[1,128], index: 2, kind: input, shape index: {}]   ;;  %s602_s3 = inlined_call_operand.vmem [shape: f32[1,128], index: 3, kind: input, shape index: {}]   ;;  %s603_s4 = inlined_call_operand.hbm [shape: f32[16,128], index: 4, kind: output, shape index: {}]  }
   0x1   :  { %10 = vsyncpa [#allocation7], 0 }
   0x2   :  { %11 = vsyncpa [#allocation5], 0  ;;  %s518_s15 = smov [#allocation3]   ;;  %s446_s19 = scalar_lea.hbm %s599_s0, 256 }
   0x3   :  { %s17_s16 = sshll.u32 %s518_s15, 4  ;;  %p447_p0 = scmp.ne.s32.totalorder %s599_s0, %s446_s19  ;;  %s18_s16 = int_to_ptr.vmem [resolvable:$true] %s17_s16 }
   0x4   :  { %p450_p1 = scmp.lt.u32.totalorder %s446_s19, %s599_s0 }
   0x6   :  { %p452_p2 = pnand %p450_p1, %p447_p0 }
   0x8   :  { %455 = shalt.err (!%p452_p2)
}
   0x9   :  { %s456_s24 = scalar_lea.vmem %s18_s16, 256  ;;  %p461_p4 = scmp.lt.s32.totalorder %s18_s16, %s18_s16 }
   0xa   :  { %p457_p3 = scmp.ne.s32.totalorder %s18_s16, %s456_s24  ;;  %p462_p5 = scmp.lt.s32.totalorder %s456_s24, %s456_s24 }
   0xc   :  { %p463_p6 = por %p462_p5, %p461_p4 }
   0xe   :  { %p464_p7 = pnand %p463_p6, %p457_p3 }
  0x10   :  { %467 = shalt.err (!%p464_p7)
}
  0x11   :  { %s519_s25 = smov 128   ;;  %s520_s26 = smov 8  }
  0x12   :  { %23 = dma.hbm_to_vmem [thread:$0]  %s599_s0, 256, %s18_s16, [#allocation4], %s519_s25, %s519_s25, %s520_s26  }
  0x13   :  { %s521_s29 = smov [#allocation6]   ;;  %s468_s7 = scalar_lea.hbm %s600_s1, 2048 }
  0x14   :  { %s29_s30 = sshll.u32 %s521_s29, 4  ;;  %p469_p8 = scmp.ne.s32.totalorder %s600_s1, %s468_s7  ;;  %s30_s30 = int_to_ptr.vmem [resolvable:$true] %s29_s30 }
  0x15   :  { %p472_p9 = scmp.lt.u32.totalorder %s468_s7, %s600_s1 }
  0x17   :  { %p474_p10 = pnand %p472_p9, %p469_p8 }
  0x19   :  { %477 = shalt.err (!%p474_p10)
}
  0x1a   :  { %s478_s12 = scalar_lea.vmem %s30_s30, 2048  ;;  %p483_p12 = scmp.lt.s32.totalorder %s30_s30, %s30_s30 }
  0x1b   :  { %p479_p11 = scmp.ne.s32.totalorder %s30_s30, %s478_s12  ;;  %p484_p13 = scmp.lt.s32.totalorder %s478_s12, %s478_s12 }
  0x1d   :  { %p485_p0 = por %p484_p13, %p483_p12 }
  0x1f   :  { %p486_p1 = pnand %p485_p0, %p479_p11 }
  0x21   :  { %489 = shalt.err (!%p486_p1)
}
  0x22   :  { %35 = dma.hbm_to_vmem [thread:$0]  %s600_s1, 2048, %s30_s30, [#allocation7], %s519_s25, %s519_s25, %s520_s26  }
  0x23   :  { %512 = dma.done.wait [#allocation4], 256  }
  0x24   :  { %513 = vsyncadd [#allocation4], 4294967040 }
  0x25   :  { %514 = dma.done.wait [#allocation7], 2048  }
  0x26   :  { %515 = vsyncadd [#allocation7], 4294965248  ;;  %v54_v0 = vld [vmem:[#allocation6] sm:$0xff]  ;;  %v55_v1 = vld [vmem:[#allocation6 + $0x8] sm:$0xff]  ;;  %s522_s17 = smov [#allocation8]  }
  0x27   :  { %v56_v2 = vld [vmem:[#allocation6 + $0x10] sm:$0xff]  ;;  %v377_v3 = vpack.c.bf16 %v55_v1, %v54_v0  ;;  %v57_v4 = vld [vmem:[#allocation6 + $0x18] sm:$0xff]  ;;  %v58_v6 = vld [vmem:[#allocation6 + $0x20] sm:$0xff]  ;;  %s256_s18 = sshll.u32 %s522_s17, 4  ;;  %s257_s18 = int_to_ptr.vmem [resolvable:$true] %s256_s18 }
  0x28   :  { %v381_v5 = vpack.c.bf16 %v57_v4, %v56_v2  ;;  %v59_v7 = vld [vmem:[#allocation6 + $0x28] sm:$0xff]  ;;  %v52_v8 = vld [vmem:[#allocation3] sm:$0xff]  ;;  %v61_v11 = vld [vmem:[#allocation6 + $0x38] sm:$0xff]  ;;  %p495_p3 = scmp.lt.s32.totalorder %s257_s18, %s257_s18 }
  0x29   :  { %378 = vmatprep.subr.bf16.mxu0 %v377_v3  ;;  %410 = vmatprep.subr.bf16.mxu1 %v377_v3  ;;  %v385_v9 = vpack.c.bf16 %v59_v7, %v58_v6  ;;  %v60_v10 = vld [vmem:[#allocation6 + $0x30] sm:$0xff]  ;;  %v62_v13 = vld [vmem:[#allocation6 + $0x40] sm:$0xff]  ;;  %v63_v14 = vld [vmem:[#allocation6 + $0x48] sm:$0xff] }
  0x2a   :  { %380 = vmatpush3.bf16.xpose.msra.mxu0 %v377_v3  ;;  %412 = vmatpush3.bf16.msra.mxu1 %v377_v3  ;;  %v389_v12 = vpack.c.bf16 %v61_v11, %v60_v10  ;;  %v393_v15 = vpack.c.bf16 %v63_v14, %v62_v13  ;;  %v64_v16 = vld [vmem:[#allocation6 + $0x50] sm:$0xff]  ;;  %v65_v17 = vld [vmem:[#allocation6 + $0x58] sm:$0xff]  ;;  %v66_v19 = vld [vmem:[#allocation6 + $0x60] sm:$0xff] }
  0x2b   :  { %382 = vmatprep.subr.bf16.mxu0 %v381_v5  ;;  %414 = vmatprep.subr.bf16.mxu1 %v381_v5  ;;  %v397_v18 = vpack.c.bf16 %v65_v17, %v64_v16  ;;  %v67_v20 = vld [vmem:[#allocation6 + $0x68] sm:$0xff]  ;;  %v68_v22 = vld [vmem:[#allocation6 + $0x70] sm:$0xff]  ;;  %v69_v23 = vld [vmem:[#allocation6 + $0x78] sm:$0xff] }
  0x2c   :  { %339 = vmatprep.mubr.f32.mxu0 %v52_v8  ;;  %v401_v21 = vpack.c.bf16 %v67_v20, %v66_v19  ;;  %v405_v24 = vpack.c.bf16 %v69_v23, %v68_v22  ;;  %v53_v25 = vld [vmem:[#allocation3 + $0x8] sm:$0xff]  ;;  %v269_v26 = vld [vmem:[%s601_s2] ss:$0 sm:$0xff]  ;;  %s490_s2 = scalar_lea.vmem %s257_s18, 256 }
  0x2d   :  { %v270_v33 = vld [vmem:[%s602_s3] ss:$0 sm:$0xff]  ;;  %p491_p2 = scmp.ne.s32.totalorder %s257_s18, %s490_s2  ;;  %p496_p4 = scmp.lt.s32.totalorder %s490_s2, %s490_s2 }
  0x2e   :  { %416 = vmatpush3.bf16.msra.mxu1 %v381_v5 }
  0x2f   :  { %418 = vmatprep.subr.bf16.mxu1 %v385_v9  ;;  %p497_p5 = por %p496_p4, %p495_p3 }
  0x31   :  { %p498_p6 = pnand %p497_p5, %p491_p2 }
  0x32   :  { %384 = vmatpush3.bf16.xpose.msra.mxu0 %v381_v5  ;;  %420 = vmatpush3.bf16.msra.mxu1 %v385_v9 }
  0x33   :  { %386 = vmatprep.subr.bf16.mxu0 %v385_v9  ;;  %422 = vmatprep.subr.bf16.mxu1 %v389_v12 }
  0x36   :  { %424 = vmatpush3.bf16.msra.mxu1 %v389_v12 }
  0x37   :  { %426 = vmatprep.subr.bf16.mxu1 %v393_v15 }
  0x3a   :  { %388 = vmatpush3.bf16.xpose.msra.mxu0 %v385_v9  ;;  %428 = vmatpush3.bf16.msra.mxu1 %v393_v15 }
  0x3b   :  { %390 = vmatprep.subr.bf16.mxu0 %v389_v12  ;;  %430 = vmatprep.subr.bf16.mxu1 %v397_v18 }
  0x3e   :  { %432 = vmatpush3.bf16.msra.mxu1 %v397_v18 }
  0x3f   :  { %434 = vmatprep.subr.bf16.mxu1 %v401_v21 }
  0x42   :  { %392 = vmatpush3.bf16.xpose.msra.mxu0 %v389_v12  ;;  %436 = vmatpush3.bf16.msra.mxu1 %v401_v21 }
  0x43   :  { %394 = vmatprep.subr.bf16.mxu0 %v393_v15  ;;  %438 = vmatprep.subr.bf16.mxu1 %v405_v24 }
  0x46   :  { %440 = vmatpush3.bf16.msra.mxu1 %v405_v24 }
  0x4a   :  { %396 = vmatpush3.bf16.xpose.msra.mxu0 %v393_v15 }
  0x4b   :  { %398 = vmatprep.subr.bf16.mxu0 %v397_v18 }
  0x52   :  { %400 = vmatpush3.bf16.xpose.msra.mxu0 %v397_v18 }
  0x53   :  { %402 = vmatprep.subr.bf16.mxu0 %v401_v21 }
  0x5a   :  { %404 = vmatpush3.bf16.xpose.msra.mxu0 %v401_v21 }
  0x5b   :  { %406 = vmatprep.subr.bf16.mxu0 %v405_v24 }
  0x62   :  { %408 = vmatpush3.bf16.xpose.msra.mxu0 %v405_v24 }
  0x69   :  { %340 = vmatmul.mubr.f32.vlgmr.msra.gmra.mrb[0].mxu0 %v53_v25 }
 0x13c   :  { %v341_v27 = vpop.f32.mrb[0].mxu0 }
 0x13d   :  { %v149_v28 = vadd.f32 %v341_v27, %v269_v26  ;;  %v143_v29 = vpop.f32.mrb[1].mxu0 }
 0x13e   :  { %v144_v30 = vadd.f32 %v269_v26, %v143_v29 }
 0x13f   :  { %v153_v32 = vmax.f32 %v149_v28, 0.0 }
 0x140   :  { %v152_v31 = vmax.f32 %v144_v30, 0.0 }
 0x142   :  { %374 = vmatprep.mubr.f32.mxu1 %v152_v31 }
 0x143   :  { %375 = vmatmul.mubr.f32.vlgmr.msra.gmra.mrb[0].mxu1 %v153_v32 }
 0x216   :  { %v376_v34 = vpop.f32.mrb[0].mxu1 }
 0x217   :  { %v248_v35 = vadd.f32 %v376_v34, %v270_v33  ;;  %v222_v36 = vpop.f32.mrb[1].mxu1 }
 0x218   :  { %v247_v37 = vadd.f32 %v270_v33, %v222_v36 }
 0x219   :  { %250 = vst [vmem:[#allocation8 + $0x8] sm:$0xff] %v248_v35 }
 0x21a   :  { %249 = vst [vmem:[#allocation8] sm:$0xff] %v247_v37 }
 0x21b   :  { %501 = shalt.err (!%p498_p6)
}
 0x21c   :  { %s502_s3 = scalar_lea.hbm %s603_s4, 256 }
 0x21d   :  { %p503_p7 = scmp.ne.s32.totalorder %s603_s4, %s502_s3  ;;  %p506_p8 = scmp.lt.u32.totalorder %s502_s3, %s603_s4 }
 0x21f   :  { %p508_p9 = pnand %p506_p8, %p503_p7 }
 0x221   :  { %511 = shalt.err (!%p508_p9)
}
 0x222   :  { %262 = dma.vmem_to_hbm [thread:$0]  %s257_s18, 256, %s603_s4, [#allocation5], %s519_s25, %s519_s25, %s520_s26  }
 0x223   :  { %516 = dma.done.wait [#allocation5], 256  }
 0x224   :  { %517 = vsyncadd [#allocation5], 4294967040 }
 0x225   :  { %266 = vsyncpa [#allocation4], 1 }
 0x226   :  { %267 = vsyncpa [#allocation7], 1 }
 0x227   :  { %268 = vsyncpa [#allocation5], 1 }

</bundles_post_ra>
